<compile_context>
chip_gen: v7x
topology: tpu7x:2x2x1
jax: 0.10.0
libtpu: 0.0.40
codegen_flags: <defaults>
</compile_context>

<pallas_src>
import functools
from typing import NamedTuple, Optional

import jax
import jax.numpy as jnp
from jax.experimental import pallas as pl
from jax.experimental.pallas import tpu as pltpu


def _round_up(v, m):
    return ((v + m - 1) // m) * m


def _cdiv(a, b):
    return (a + b - 1) // b


@functools.lru_cache(maxsize=1)
def _device_kind():
    try:
        return jax.devices()[0].device_kind.lower()
    except Exception:
        return ""


@functools.lru_cache(maxsize=1)
def _vmem_capacity_bytes():
    try:
        return int(pltpu.get_tpu_info().vmem_capacity_bytes)
    except Exception:
        return 64 * 2**20  # conservative default (v7x per-TensorCore VMEM)


class _Plan(NamedTuple):
    tile_b: int
    n_btiles: int
    batch_p: int
    in_p: int
    w_p: int
    out_p: int
    lps: int          # hidden layers per depth-grid step
    n_dsteps: int
    compute_dtype: str
    hidden_dtype: str
    out_dtype: str
    use_buffered: bool
    vmem_limit: int


def _plan(batch, input_size, width, depth, output_size, *,
          tile_b, compute_dtype, hidden_bf16, force_layers_per_step,
          out_dtype, use_buffered):
    assert depth >= 1, "pheNN Pallas kernel expects depth >= 1 hidden layers"
    cdt = jnp.dtype(compute_dtype)
    odt = jnp.dtype(out_dtype)
    itemsize = cdt.itemsize

    in_p = _round_up(input_size, 128)
    w_p = _round_up(width, 128)
    out_p = _round_up(output_size, 128)

    # hidden elementwise / MXU-pop dtype: bf16 only when compute is bf16 AND the VPU has
    # native bf16 (v6e / v7x); v5e and older round-trip bf16 elementwise through f32.
    kind = _device_kind()
    if hidden_bf16 is None:
        hidden_bf16 = ("v6" in kind) or ("v7" in kind)
    hidden_bf16 = bool(hidden_bf16) and cdt == jnp.dtype(jnp.bfloat16)
    hdt = jnp.dtype(jnp.bfloat16) if hidden_bf16 else jnp.dtype(jnp.float32)

    def _sub(dt):  # sublane tile for the second-to-last dim
        return max(8, 32 // jnp.dtype(dt).itemsize)
    sublane = max(_sub(cdt), _sub(hdt), _sub(odt))

    if tile_b is None:
        # Target M~256 (feeds the 256-tall v6e/v7x MXU, amortizes ~0.35us/grid-step),
        # minimize batch padding, and keep >=2 grid steps when the batch allows it so the
        # "parallel" axis can shard across both TensorCores on v7x (free elsewhere).
        min_tiles = 2 if batch >= 2 * sublane else 1
        n = max(min_tiles, _cdiv(batch, 256))
        tile_b = min(_round_up(_cdiv(batch, n), sublane), 512)
    tile_b = max(sublane, _round_up(int(tile_b), sublane))
    tile_b = min(tile_b, _round_up(batch, sublane))
    n_btiles = _cdiv(batch, tile_b)
    batch_p = n_btiles * tile_b

    # ---- VMEM budget: ~85% of the chip's physical per-core VMEM
    vmem_budget = int(0.85 * _vmem_capacity_bytes())

    # ---- hidden stack: fully VMEM-resident if it fits ~1/3 of the budget, otherwise
    #      stream `lps` layers per step of a second ("arbitrary") grid axis (lps divides
    #      depth so no padding layers are needed; streamed blocks are double-buffered).
    per_layer = w_p * w_p * itemsize
    hid_budget = max(per_layer, vmem_budget // 3)
    if force_layers_per_step is not None:
        lps = max(1, min(int(force_layers_per_step), depth))
    elif depth * per_layer <= hid_budget:
        lps = depth
    else:
        lps = max(1, min(depth, hid_budget // (2 * per_layer)))
    while depth % lps:
        lps -= 1
    n_dsteps = depth // lps
    resident_hid = n_dsteps == 1

    # ---- VMEM request (capped at the budget)
    wbuf = 1 if use_buffered else 2
    hid_bufs = wbuf if resident_hid else 2
    weight_bytes = ((in_p * w_p + w_p * out_p) * itemsize * wbuf
                    + lps * per_layer * hid_bufs)
    bias_bytes = 2 * ((w_p + out_p) * 4 + depth * w_p * hdt.itemsize)
    act_bytes = (2 * tile_b * in_p * itemsize         # x   (double-buffered)
                 + 2 * tile_b * out_p * odt.itemsize  # out (double-buffered)
                 + tile_b * w_p * hdt.itemsize)       # h scratch
    need = weight_bytes + bias_bytes + act_bytes
    vmem_limit = int(min(vmem_budget, max(2 * need, 16 * 2**20)))

    return _Plan(tile_b=tile_b, n_btiles=n_btiles, batch_p=batch_p,
                 in_p=in_p, w_p=w_p, out_p=out_p, lps=lps, n_dsteps=n_dsteps,
                 compute_dtype=cdt.name, hidden_dtype=hdt.name, out_dtype=odt.name,
                 use_buffered=bool(use_buffered), vmem_limit=vmem_limit)


def _phenn_kernel(lps,
                  x_ref, w_in_ref, b_in_ref,
                  w_hid_ref, b_hid_ref,
                  w_out_ref, b_out_ref,
                  out_ref, h_ref):
    cdt = w_in_ref.dtype   # MXU input dtype (f32 or bf16)
    hdt = h_ref.dtype      # hidden elementwise dtype (f32; bf16 on v6e/v7x bf16 path)
    d = pl.program_id(1)

    # inlayer on the first depth step only (NO ReLU after it, matching the reference)
    @pl.when(d == 0)
    def _():
        h0 = jnp.dot(x_ref[...].astype(cdt), w_in_ref[...],
                     preferred_element_type=jnp.float32)
        h_ref[...] = (h0 + b_in_ref[...]).astype(hdt)

    # this step's slice of the hidden stack: lps x (Linear(width, width) + ReLU)
    h = h_ref[...]
    for i in range(lps):
        h = jnp.dot(h.astype(cdt), w_hid_ref[i], preferred_element_type=hdt)
        h = jnp.maximum(h + b_hid_ref[i], 0.0)
    h_ref[...] = h.astype(hdt)

    # outlayer on the last depth step only (f32 accumulation), then write back
    @pl.when(d == pl.num_programs(1) - 1)
    def _():
        y = jnp.dot(h_ref[...].astype(cdt), w_out_ref[...],
                    preferred_element_type=jnp.float32)
        out_ref[...] = (y + b_out_ref[...]).astype(out_ref.dtype)


@functools.partial(jax.jit, static_argnames=("plan",))
def _phenn_impl(x, w_in, b_in, w_hid, b_hid, w_out, b_out, *, plan: _Plan):
    batch, input_size = x.shape
    depth, width, _ = w_hid.shape
    output_size = w_out.shape[1]
    p = plan
    cdt = jnp.dtype(p.compute_dtype)
    hdt = jnp.dtype(p.hidden_dtype)
    odt = jnp.dtype(p.out_dtype)

    # ---- zero-pad (mathematically a no-op) + cast MXU inputs. Casting x here halves the
    #      streamed per-step HBM bytes on the bf16 path.
    xp = jnp.pad(x, ((0, p.batch_p - batch), (0, p.in_p - input_size))).astype(cdt)
    w_in_p = jnp.pad(w_in, ((0, p.in_p - input_size), (0, p.w_p - width))).astype(cdt)
    b_in_p = jnp.pad(b_in.reshape(1, -1),
                     ((0, 0), (0, p.w_p - width))).astype(jnp.float32)
    w_hid_p = jnp.pad(w_hid, ((0, 0), (0, p.w_p - width), (0, p.w_p - width))).astype(cdt)
    b_hid_p = jnp.pad(b_hid, ((0, 0), (0, p.w_p - width))).astype(hdt)[:, None, :]
    w_out_p = jnp.pad(w_out, ((0, p.w_p - width), (0, p.out_p - output_size))).astype(cdt)
    b_out_p = jnp.pad(b_out.reshape(1, -1),
                      ((0, 0), (0, p.out_p - output_size))).astype(jnp.float32)

    resident_hid = p.n_dsteps == 1

    def const_spec(shape):
        idx = lambda i, d, _n=len(shape): (0,) * _n
        if p.use_buffered:
            # invariant block: a single VMEM buffer is enough (halves resident footprint)
            return pl.BlockSpec(shape, idx, pipeline_mode=pl.Buffered(1))
        return pl.BlockSpec(shape, idx)

    if resident_hid:
        w_hid_spec = const_spec((depth, p.w_p, p.w_p))
        b_hid_spec = const_spec((depth, 1, p.w_p))
    else:
        # stream lps layers per depth step; default double-buffering prefetches the next
        # block's weights underneath the current block's matmuls
        w_hid_spec = pl.BlockSpec((p.lps, p.w_p, p.w_p), lambda i, d: (d, 0, 0))
        b_hid_spec = pl.BlockSpec((p.lps, 1, p.w_p), lambda i, d: (d, 0, 0))

    kernel = functools.partial(_phenn_kernel, p.lps)

    itemsize = cdt.itemsize
    flops = 2 * p.batch_p * (p.in_p * p.w_p + depth * p.w_p * p.w_p + p.w_p * p.out_p)
    hid_reads = 1 if resident_hid else p.n_btiles
    bytes_accessed = (xp.size * itemsize
                      + (w_in_p.size + w_out_p.size) * itemsize
                      + w_hid_p.size * itemsize * hid_reads
                      + (b_in_p.size + b_out_p.size) * 4 + b_hid_p.size * hdt.itemsize
                      + p.batch_p * p.out_p * odt.itemsize)

    out_padded = pl.pallas_call(
        kernel,
        out_shape=jax.ShapeDtypeStruct((p.batch_p, p.out_p), odt),
        grid=(p.n_btiles, p.n_dsteps),
        in_specs=[
            pl.BlockSpec((p.tile_b, p.in_p), lambda i, d: (i, 0)),  # x: tiled over batch
            const_spec((p.in_p, p.w_p)),                            # w_in  (VMEM-resident)
            const_spec((1, p.w_p)),                                 # b_in
            w_hid_spec,                                             # w_hid (resident/streamed)
            b_hid_spec,                                             # b_hid
            const_spec((p.w_p, p.out_p)),                           # w_out (VMEM-resident)
            const_spec((1, p.out_p)),                               # b_out
        ],
        out_specs=pl.BlockSpec((p.tile_b, p.out_p), lambda i, d: (i, 0)),
        scratch_shapes=[pltpu.VMEM((p.tile_b, p.w_p), hdt)],        # h carried over depth steps
        compiler_params=pltpu.CompilerParams(
            dimension_semantics=("parallel", "arbitrary"),
            vmem_limit_bytes=p.vmem_limit),
        cost_estimate=pl.CostEstimate(flops=flops, transcendentals=0,
                                      bytes_accessed=bytes_accessed),
    )(xp, w_in_p, b_in_p, w_hid_p, b_hid_p, w_out_p, b_out_p)

    return out_padded[:batch, :output_size]


def phenn_forward(x, w_in, b_in, w_hid, b_hid, w_out, b_out, *,
                  tile_b=None, compute_dtype=jnp.float32,
                  hidden_bf16: Optional[bool] = None,
                  force_layers_per_step: Optional[int] = None,
                  out_dtype=None):
    """Fused pheNN forward. Weights are (in_features, out_features) (pre-transposed vs
    PyTorch), biases flat. Batch is tiled over a parallel grid axis; the hidden weight
    stack is VMEM-resident or streamed over a depth grid axis depending on VMEM."""
    batch, input_size = x.shape
    depth, width, _ = w_hid.shape
    output_size = w_out.shape[1]
    if out_dtype is None:
        out_dtype = x.dtype

    args = (x, w_in, b_in, w_hid, b_hid, w_out, b_out)
    plan_kwargs = dict(tile_b=tile_b, compute_dtype=compute_dtype,
                       hidden_bf16=hidden_bf16,
                       force_layers_per_step=force_layers_per_step,
                       out_dtype=out_dtype)
    plan = _plan(batch, input_size, width, depth, output_size,
                 use_buffered=True, **plan_kwargs)
    try:
        return _phenn_impl(*args, plan=plan)
    except Exception:
        # pl.Buffered(1) single-buffering of invariant weight blocks is purely a VMEM
        # optimization; fall back to default double-buffering if this JAX rejects it.
        plan = _plan(batch, input_size, width, depth, output_size,
                     use_buffered=False, **plan_kwargs)
        return _phenn_impl(*args, plan=plan)


def init_phenn_params(key, input_size, output_size, depth, width):
    """torch.nn.Linear-style init (U[-1/sqrt(fan_in), 1/sqrt(fan_in)]). Weights stored as
    (in_features, out_features); biases flat."""
    keys = jax.random.split(key, 2 * (depth + 2))

    def linear(kw, kb, fan_in, fan_out):
        bound = 1.0 / (fan_in ** 0.5)
        w = jax.random.uniform(kw, (fan_in, fan_out), jnp.float32, -bound, bound)
        b = jax.random.uniform(kb, (fan_out,), jnp.float32, -bound, bound)
        return w, b

    w_in, b_in = linear(keys[0], keys[1], input_size, width)
    hw, hb = [], []
    for i in range(depth):
        w, b = linear(keys[2 + 2 * i], keys[3 + 2 * i], width, width)
        hw.append(w); hb.append(b)
    w_hid = jnp.stack(hw, axis=0)     # (depth, width, width)
    b_hid = jnp.stack(hb, axis=0)     # (depth, width)
    w_out, b_out = linear(keys[-2], keys[-1], width, output_size)
    return w_in, b_in, w_hid, b_hid, w_out, b_out


def phenn_reference(x, w_in, b_in, w_hid, b_hid, w_out, b_out):
    h = x @ w_in + b_in
    for i in range(w_hid.shape[0]):
        h = jnp.maximum(h @ w_hid[i] + b_hid[i], 0.0)
    return h @ w_out + b_out


if __name__ == "__main__":
    kx, kp, kx2, kp2 = jax.random.split(jax.random.PRNGKey(0), 4)

    # base config: input_size=16, output_size=4, depth=2, width=32, batch=8
    x = jax.random.normal(kx, (8, 16), jnp.float32)
    params = init_phenn_params(kp, 16, 4, 2, 32)
    ref = phenn_reference(x, *params)

    # f32 MXU-input path, hidden stack fully VMEM-resident
    out_f32 = jax.block_until_ready(phenn_forward(x, *params))
    assert out_f32.shape == ref.shape
    assert jnp.allclose(out_f32, ref, atol=1e-5, rtol=1e-5), "f32 mismatch vs reference"

    # bf16 MXU-input / f32-accumulate path (bf16 hidden elementwise on v6e/v7x)
    out_bf16 = jax.block_until_ready(
        phenn_forward(x, *params, compute_dtype=jnp.bfloat16))
    assert jnp.allclose(out_bf16, ref, atol=5e-2, rtol=5e-2), "bf16 mismatch vs reference"

    # force the streamed-w_hid path (depth grid axis, h carried in VMEM scratch)
    out_stream = jax.block_until_ready(
        phenn_forward(x, *params, force_layers_per_step=1))
    assert jnp.allclose(out_stream, ref, atol=1e-5, rtol=1e-5), "streamed-w_hid mismatch"

    # multiple batch tiles + streamed hidden stack (grid = (2 batch tiles, 2 depth steps))
    x2 = jax.random.normal(kx2, (48, 16), jnp.float32)
    params2 = init_phenn_params(kp2, 16, 4, 4, 32)
    ref2 = phenn_reference(x2, *params2)
    out2 = jax.block_until_ready(
        phenn_forward(x2, *params2, force_layers_per_step=2))
    assert jnp.allclose(out2, ref2, atol=1e-4, rtol=1e-4), "multi-tile mismatch"

    print("KERNEL_OK")
</pallas_src>

<mosaic_0001>
module attributes {stable_mosaic.version = 11 : i64} {
  func.func @_phenn_kernel(%arg0: i32, %arg1: i32, %arg2: memref<8x128xf32, #tpu.memory_space<vmem>>, %arg3: memref<128x128xf32, #tpu.memory_space<vmem>>, %arg4: memref<1x128xf32, #tpu.memory_space<vmem>>, %arg5: memref<2x128x128xf32, #tpu.memory_space<vmem>>, %arg6: memref<2x1x128xf32, #tpu.memory_space<vmem>>, %arg7: memref<128x128xf32, #tpu.memory_space<vmem>>, %arg8: memref<1x128xf32, #tpu.memory_space<vmem>>, %arg9: memref<8x128xf32, #tpu.memory_space<vmem>>, %arg10: memref<8x128xf32, #tpu.memory_space<vmem>>) attributes {dimension_semantics = [#tpu.dimension_semantics<parallel>, #tpu.dimension_semantics<arbitrary>], iteration_bounds = array<i64: 1, 1>, scalar_prefetch = 0 : i64, scratch_operands = 1 : i64, tpu.core_type = #tpu.core_type<tc>, window_params = [{transform_indices = @transform_0, window_bounds = array<i64: 8, 128>}, {pipeline_mode = #tpu.pipeline_mode<synchronous>, transform_indices = @transform_1, window_bounds = array<i64: 128, 128>}, {pipeline_mode = #tpu.pipeline_mode<synchronous>, transform_indices = @transform_2, window_bounds = array<i64: 1, 128>}, {pipeline_mode = #tpu.pipeline_mode<synchronous>, transform_indices = @transform_3, window_bounds = array<i64: 2, 128, 128>}, {pipeline_mode = #tpu.pipeline_mode<synchronous>, transform_indices = @transform_4, window_bounds = array<i64: 2, 1, 128>}, {pipeline_mode = #tpu.pipeline_mode<synchronous>, transform_indices = @transform_5, window_bounds = array<i64: 128, 128>}, {pipeline_mode = #tpu.pipeline_mode<synchronous>, transform_indices = @transform_6, window_bounds = array<i64: 1, 128>}, {transform_indices = @transform_7, window_bounds = array<i64: 8, 128>}]} {
    %c0_i32 = arith.constant 0 : i32
    %0 = arith.cmpi eq, %arg1, %c0_i32 : i32
    %1 = arith.extui %0 : i1 to i32
    %c0_i32_0 = arith.constant 0 : i32
    %2 = arith.cmpi ne, %1, %c0_i32_0 : i32
    scf.if %2 {
      %c0_20 = arith.constant 0 : index
      %c0_21 = arith.constant 0 : index
      %26 = vector.load %arg2[%c0_20, %c0_21] : memref<8x128xf32, #tpu.memory_space<vmem>>, vector<8x128xf32>
      %c0_22 = arith.constant 0 : index
      %c0_23 = arith.constant 0 : index
      %27 = vector.load %arg3[%c0_22, %c0_23] : memref<128x128xf32, #tpu.memory_space<vmem>>, vector<128x128xf32>
      %cst_24 = arith.constant dense<0.000000e+00> : vector<8x128xf32>
      %28 = tpu.matmul %26, %27, %cst_24 {dimension_numbers = #tpu.dot_dimension_numbers<[1], [0], [0], [1], [0, 0, 1, 1], [], []>} : vector<8x128xf32>, vector<128x128xf32>, vector<8x128xf32> -> vector<8x128xf32>
      %c0_25 = arith.constant 0 : index
      %c0_26 = arith.constant 0 : index
      %29 = vector.load %arg4[%c0_25, %c0_26] : memref<1x128xf32, #tpu.memory_space<vmem>>, vector<1x128xf32>
      %30 = vector.broadcast %29 : vector<1x128xf32> to vector<8x128xf32>
      %31 = arith.addf %28, %30 : vector<8x128xf32>
      %c0_27 = arith.constant 0 : index
      %c0_28 = arith.constant 0 : index
      %32 = vector.load %arg10[%c0_27, %c0_28] : memref<8x128xf32, #tpu.memory_space<vmem>>, vector<8x128xf32>
      tpu.vector_store %arg10[%c0_27, %c0_28], %31 {strides = array<i32>} : memref<8x128xf32, #tpu.memory_space<vmem>>, vector<8x128xf32>,
    } else {
    }
    %c0 = arith.constant 0 : index
    %c0_1 = arith.constant 0 : index
    %3 = vector.load %arg10[%c0, %c0_1] : memref<8x128xf32, #tpu.memory_space<vmem>>, vector<8x128xf32>
    %c0_2 = arith.constant 0 : index
    %c0_3 = arith.constant 0 : index
    %c0_4 = arith.constant 0 : index
    %4 = vector.load %arg5[%c0_2, %c0_3, %c0_4] : memref<2x128x128xf32, #tpu.memory_space<vmem>>, vector<1x128x128xf32>
    %5 = vector.shape_cast %4 : vector<1x128x128xf32> to vector<128x128xf32>
    %cst = arith.constant dense<0.000000e+00> : vector<8x128xf32>
    %6 = tpu.matmul %3, %5, %cst {dimension_numbers = #tpu.dot_dimension_numbers<[1], [0], [0], [1], [0, 0, 1, 1], [], []>} : vector<8x128xf32>, vector<128x128xf32>, vector<8x128xf32> -> vector<8x128xf32>
    %c0_5 = arith.constant 0 : index
    %c0_6 = arith.constant 0 : index
    %c0_7 = arith.constant 0 : index
    %7 = vector.load %arg6[%c0_5, %c0_6, %c0_7] : memref<2x1x128xf32, #tpu.memory_space<vmem>>, vector<1x1x128xf32>
    %8 = vector.shape_cast %7 : vector<1x1x128xf32> to vector<1x128xf32>
    %9 = vector.broadcast %8 : vector<1x128xf32> to vector<8x128xf32>
    %10 = arith.addf %6, %9 : vector<8x128xf32>
    %cst_8 = arith.constant 0.000000e+00 : f32
    %11 = vector.broadcast %cst_8 : f32 to vector<8x128xf32>
    %12 = arith.maximumf %10, %11 : vector<8x128xf32>
    %c1 = arith.constant 1 : index
    %c0_9 = arith.constant 0 : index
    %c0_10 = arith.constant 0 : index
    %13 = vector.load %arg5[%c1, %c0_9, %c0_10] : memref<2x128x128xf32, #tpu.memory_space<vmem>>, vector<1x128x128xf32>
    %14 = vector.shape_cast %13 : vector<1x128x128xf32> to vector<128x128xf32>
    %cst_11 = arith.constant dense<0.000000e+00> : vector<8x128xf32>
    %15 = tpu.matmul %12, %14, %cst_11 {dimension_numbers = #tpu.dot_dimension_numbers<[1], [0], [0], [1], [0, 0, 1, 1], [], []>} : vector<8x128xf32>, vector<128x128xf32>, vector<8x128xf32> -> vector<8x128xf32>
    %c1_12 = arith.constant 1 : index
    %c0_13 = arith.constant 0 : index
    %c0_14 = arith.constant 0 : index
    %16 = vector.load %arg6[%c1_12, %c0_13, %c0_14] : memref<2x1x128xf32, #tpu.memory_space<vmem>>, vector<1x1x128xf32>
    %17 = vector.shape_cast %16 : vector<1x1x128xf32> to vector<1x128xf32>
    %18 = vector.broadcast %17 : vector<1x128xf32> to vector<8x128xf32>
    %19 = arith.addf %15, %18 : vector<8x128xf32>
    %cst_15 = arith.constant 0.000000e+00 : f32
    %20 = vector.broadcast %cst_15 : f32 to vector<8x128xf32>
    %21 = arith.maximumf %19, %20 : vector<8x128xf32>
    %c0_16 = arith.constant 0 : index
    %c0_17 = arith.constant 0 : index
    %22 = vector.load %arg10[%c0_16, %c0_17] : memref<8x128xf32, #tpu.memory_space<vmem>>, vector<8x128xf32>
    tpu.vector_store %arg10[%c0_16, %c0_17], %21 {strides = array<i32>} : memref<8x128xf32, #tpu.memory_space<vmem>>, vector<8x128xf32>,
    %c0_i32_18 = arith.constant 0 : i32
    %23 = arith.cmpi eq, %arg1, %c0_i32_18 : i32
    %24 = arith.extui %23 : i1 to i32
    %c0_i32_19 = arith.constant 0 : i32
    %25 = arith.cmpi ne, %24, %c0_i32_19 : i32
    scf.if %25 {
      %c0_20 = arith.constant 0 : index
      %c0_21 = arith.constant 0 : index
      %26 = vector.load %arg10[%c0_20, %c0_21] : memref<8x128xf32, #tpu.memory_space<vmem>>, vector<8x128xf32>
      %c0_22 = arith.constant 0 : index
      %c0_23 = arith.constant 0 : index
      %27 = vector.load %arg7[%c0_22, %c0_23] : memref<128x128xf32, #tpu.memory_space<vmem>>, vector<128x128xf32>
      %cst_24 = arith.constant dense<0.000000e+00> : vector<8x128xf32>
      %28 = tpu.matmul %26, %27, %cst_24 {dimension_numbers = #tpu.dot_dimension_numbers<[1], [0], [0], [1], [0, 0, 1, 1], [], []>} : vector<8x128xf32>, vector<128x128xf32>, vector<8x128xf32> -> vector<8x128xf32>
      %c0_25 = arith.constant 0 : index
      %c0_26 = arith.constant 0 : index
      %29 = vector.load %arg8[%c0_25, %c0_26] : memref<1x128xf32, #tpu.memory_space<vmem>>, vector<1x128xf32>
      %30 = vector.broadcast %29 : vector<1x128xf32> to vector<8x128xf32>
      %31 = arith.addf %28, %30 : vector<8x128xf32>
      %c0_27 = arith.constant 0 : index
      %c0_28 = arith.constant 0 : index
      %32 = vector.load %arg9[%c0_27, %c0_28] : memref<8x128xf32, #tpu.memory_space<vmem>>, vector<8x128xf32>
      tpu.vector_store %arg9[%c0_27, %c0_28], %31 {strides = array<i32>} : memref<8x128xf32, #tpu.memory_space<vmem>>, vector<8x128xf32>,
    } else {
    }
    return
  }
  func.func @transform_0(%arg0: i32, %arg1: i32) -> (i32, i32) {
    %c0_i32 = arith.constant 0 : i32
    %c0_i32_0 = arith.constant 0 : i32
    return %arg0, %c0_i32 : i32, i32
  }
  func.func @transform_1(%arg0: i32, %arg1: i32) -> (i32, i32) {
    %c0_i32 = arith.constant 0 : i32
    %c0_i32_0 = arith.constant 0 : i32
    %c0_i32_1 = arith.constant 0 : i32
    return %c0_i32, %c0_i32_0 : i32, i32
  }
  func.func @transform_2(%arg0: i32, %arg1: i32) -> (i32, i32) {
    %c0_i32 = arith.constant 0 : i32
    %c0_i32_0 = arith.constant 0 : i32
    %c0_i32_1 = arith.constant 0 : i32
    return %c0_i32, %c0_i32_0 : i32, i32
  }
  func.func @transform_3(%arg0: i32, %arg1: i32) -> (i32, i32, i32) {
    %c0_i32 = arith.constant 0 : i32
    %c0_i32_0 = arith.constant 0 : i32
    %c0_i32_1 = arith.constant 0 : i32
    %c0_i32_2 = arith.constant 0 : i32
    return %c0_i32, %c0_i32_0, %c0_i32_1 : i32, i32, i32
  }
  func.func @transform_4(%arg0: i32, %arg1: i32) -> (i32, i32, i32) {
    %c0_i32 = arith.constant 0 : i32
    %c0_i32_0 = arith.constant 0 : i32
    %c0_i32_1 = arith.constant 0 : i32
    %c0_i32_2 = arith.constant 0 : i32
    return %c0_i32, %c0_i32_0, %c0_i32_1 : i32, i32, i32
  }
  func.func @transform_5(%arg0: i32, %arg1: i32) -> (i32, i32) {
    %c0_i32 = arith.constant 0 : i32
    %c0_i32_0 = arith.constant 0 : i32
    %c0_i32_1 = arith.constant 0 : i32
    return %c0_i32, %c0_i32_0 : i32, i32
  }
  func.func @transform_6(%arg0: i32, %arg1: i32) -> (i32, i32) {
    %c0_i32 = arith.constant 0 : i32
    %c0_i32_0 = arith.constant 0 : i32
    %c0_i32_1 = arith.constant 0 : i32
    return %c0_i32, %c0_i32_0 : i32, i32
  }
  func.func @transform_7(%arg0: i32, %arg1: i32) -> (i32, i32) {
    %c0_i32 = arith.constant 0 : i32
    %c0_i32_0 = arith.constant 0 : i32
    return %arg0, %c0_i32 : i32, i32
  }
}

module attributes {stable_mosaic.version = 11 : i64} {
  func.func @_phenn_kernel(%arg0: i32, %arg1: i32, %arg2: memref<8x128xf32, #tpu.memory_space<vmem>>, %arg3: memref<128x128xf32, #tpu.memory_space<vmem>>, %arg4: memref<1x128xf32, #tpu.memory_space<vmem>>, %arg5: memref<2x128x128xf32, #tpu.memory_space<vmem>>, %arg6: memref<2x1x128xf32, #tpu.memory_space<vmem>>, %arg7: memref<128x128xf32, #tpu.memory_space<vmem>>, %arg8: memref<1x128xf32, #tpu.memory_space<vmem>>, %arg9: memref<8x128xf32, #tpu.memory_space<vmem>>, %arg10: memref<8x128xf32, #tpu.memory_space<vmem>>) attributes {dimension_semantics = [#tpu.dimension_semantics<parallel>, #tpu.dimension_semantics<arbitrary>], iteration_bounds = array<i64: 1, 1>, scalar_prefetch = 0 : i64, scratch_operands = 1 : i64, tpu.core_type = #tpu.core_type<tc>, window_params = [{transform_indices = @transform_0, window_bounds = array<i64: 8, 128>}, {pipeline_mode = #tpu.pipeline_mode<synchronous>, transform_indices = @transform_1, window_bounds = array<i64: 128, 128>}, {pipeline_mode = #tpu.pipeline_mode<synchronous>, transform_indices = @transform_2, window_bounds = array<i64: 1, 128>}, {pipeline_mode = #tpu.pipeline_mode<synchronous>, transform_indices = @transform_3, window_bounds = array<i64: 2, 128, 128>}, {pipeline_mode = #tpu.pipeline_mode<synchronous>, transform_indices = @transform_4, window_bounds = array<i64: 2, 1, 128>}, {pipeline_mode = #tpu.pipeline_mode<synchronous>, transform_indices = @transform_5, window_bounds = array<i64: 128, 128>}, {pipeline_mode = #tpu.pipeline_mode<synchronous>, transform_indices = @transform_6, window_bounds = array<i64: 1, 128>}, {transform_indices = @transform_7, window_bounds = array<i64: 8, 128>}]} {
    %c0_i32 = arith.constant 0 : i32
    %0 = arith.cmpi eq, %arg1, %c0_i32 : i32
    %1 = arith.extui %0 : i1 to i32
    %c0_i32_0 = arith.constant 0 : i32
    %2 = arith.cmpi ne, %1, %c0_i32_0 : i32
    scf.if %2 {
      %c0_20 = arith.constant 0 : index
      %c0_21 = arith.constant 0 : index
      %26 = vector.load %arg2[%c0_20, %c0_21] : memref<8x128xf32, #tpu.memory_space<vmem>>, vector<8x128xf32>
      %c0_22 = arith.constant 0 : index
      %c0_23 = arith.constant 0 : index
      %27 = vector.load %arg3[%c0_22, %c0_23] : memref<128x128xf32, #tpu.memory_space<vmem>>, vector<128x128xf32>
      %cst_24 = arith.constant dense<0.000000e+00> : vector<8x128xf32>
      %28 = tpu.matmul %26, %27, %cst_24 {dimension_numbers = #tpu.dot_dimension_numbers<[1], [0], [0], [1], [0, 0, 1, 1], [], []>} : vector<8x128xf32>, vector<128x128xf32>, vector<8x128xf32> -> vector<8x128xf32>
      %c0_25 = arith.constant 0 : index
      %c0_26 = arith.constant 0 : index
      %29 = vector.load %arg4[%c0_25, %c0_26] : memref<1x128xf32, #tpu.memory_space<vmem>>, vector<1x128xf32>
      %30 = vector.broadcast %29 : vector<1x128xf32> to vector<8x128xf32>
      %31 = arith.addf %28, %30 : vector<8x128xf32>
      %c0_27 = arith.constant 0 : index
      %c0_28 = arith.constant 0 : index
      %32 = vector.load %arg10[%c0_27, %c0_28] : memref<8x128xf32, #tpu.memory_space<vmem>>, vector<8x128xf32>
      tpu.vector_store %arg10[%c0_27, %c0_28], %31 {strides = array<i32>} : memref<8x128xf32, #tpu.memory_space<vmem>>, vector<8x128xf32>,
    } else {
    }
    %c0 = arith.constant 0 : index
    %c0_1 = arith.constant 0 : index
    %3 = vector.load %arg10[%c0, %c0_1] : memref<8x128xf32, #tpu.memory_space<vmem>>, vector<8x128xf32>
    %c0_2 = arith.constant 0 : index
    %c0_3 = arith.constant 0 : index
    %c0_4 = arith.constant 0 : index
    %4 = vector.load %arg5[%c0_2, %c0_3, %c0_4] : memref<2x128x128xf32, #tpu.memory_space<vmem>>, vector<1x128x128xf32>
    %5 = vector.shape_cast %4 : vector<1x128x128xf32> to vector<128x128xf32>
    %cst = arith.constant dense<0.000000e+00> : vector<8x128xf32>
    %6 = tpu.matmul %3, %5, %cst {dimension_numbers = #tpu.dot_dimension_numbers<[1], [0], [0], [1], [0, 0, 1, 1], [], []>} : vector<8x128xf32>, vector<128x128xf32>, vector<8x128xf32> -> vector<8x128xf32>
    %c0_5 = arith.constant 0 : index
    %c0_6 = arith.constant 0 : index
    %c0_7 = arith.constant 0 : index
    %7 = vector.load %arg6[%c0_5, %c0_6, %c0_7] : memref<2x1x128xf32, #tpu.memory_space<vmem>>, vector<1x1x128xf32>
    %8 = vector.shape_cast %7 : vector<1x1x128xf32> to vector<1x128xf32>
    %9 = vector.broadcast %8 : vector<1x128xf32> to vector<8x128xf32>
    %10 = arith.addf %6, %9 : vector<8x128xf32>
    %cst_8 = arith.constant 0.000000e+00 : f32
    %11 = vector.broadcast %cst_8 : f32 to vector<8x128xf32>
    %12 = arith.maximumf %10, %11 : vector<8x128xf32>
    %c1 = arith.constant 1 : index
    %c0_9 = arith.constant 0 : index
    %c0_10 = arith.constant 0 : index
    %13 = vector.load %arg5[%c1, %c0_9, %c0_10] : memref<2x128x128xf32, #tpu.memory_space<vmem>>, vector<1x128x128xf32>
    %14 = vector.shape_cast %13 : vector<1x128x128xf32> to vector<128x128xf32>
    %cst_11 = arith.constant dense<0.000000e+00> : vector<8x128xf32>
    %15 = tpu.matmul %12, %14, %cst_11 {dimension_numbers = #tpu.dot_dimension_numbers<[1], [0], [0], [1], [0, 0, 1, 1], [], []>} : vector<8x128xf32>, vector<128x128xf32>, vector<8x128xf32> -> vector<8x128xf32>
    %c1_12 = arith.constant 1 : index
    %c0_13 = arith.constant 0 : index
    %c0_14 = arith.constant 0 : index
    %16 = vector.load %arg6[%c1_12, %c0_13, %c0_14] : memref<2x1x128xf32, #tpu.memory_space<vmem>>, vector<1x1x128xf32>
    %17 = vector.shape_cast %16 : vector<1x1x128xf32> to vector<1x128xf32>
    %18 = vector.broadcast %17 : vector<1x128xf32> to vector<8x128xf32>
    %19 = arith.addf %15, %18 : vector<8x128xf32>
    %cst_15 = arith.constant 0.000000e+00 : f32
    %20 = vector.broadcast %cst_15 : f32 to vector<8x128xf32>
    %21 = arith.maximumf %19, %20 : vector<8x128xf32>
    %c0_16 = arith.constant 0 : index
    %c0_17 = arith.constant 0 : index
    %22 = vector.load %arg10[%c0_16, %c0_17] : memref<8x128xf32, #tpu.memory_space<vmem>>, vector<8x128xf32>
    tpu.vector_store %arg10[%c0_16, %c0_17], %21 {strides = array<i32>} : memref<8x128xf32, #tpu.memory_space<vmem>>, vector<8x128xf32>,
    %c0_i32_18 = arith.constant 0 : i32
    %23 = arith.cmpi eq, %arg1, %c0_i32_18 : i32
    %24 = arith.extui %23 : i1 to i32
    %c0_i32_19 = arith.constant 0 : i32
    %25 = arith.cmpi ne, %24, %c0_i32_19 : i32
    scf.if %25 {
      %c0_20 = arith.constant 0 : index
      %c0_21 = arith.constant 0 : index
      %26 = vector.load %arg10[%c0_20, %c0_21] : memref<8x128xf32, #tpu.memory_space<vmem>>, vector<8x128xf32>
      %c0_22 = arith.constant 0 : index
      %c0_23 = arith.constant 0 : index
      %27 = vector.load %arg7[%c0_22, %c0_23] : memref<128x128xf32, #tpu.memory_space<vmem>>, vector<128x128xf32>
      %cst_24 = arith.constant dense<0.000000e+00> : vector<8x128xf32>
      %28 = tpu.matmul %26, %27, %cst_24 {dimension_numbers = #tpu.dot_dimension_numbers<[1], [0], [0], [1], [0, 0, 1, 1], [], []>} : vector<8x128xf32>, vector<128x128xf32>, vector<8x128xf32> -> vector<8x128xf32>
      %c0_25 = arith.constant 0 : index
      %c0_26 = arith.constant 0 : index
      %29 = vector.load %arg8[%c0_25, %c0_26] : memref<1x128xf32, #tpu.memory_space<vmem>>, vector<1x128xf32>
      %30 = vector.broadcast %29 : vector<1x128xf32> to vector<8x128xf32>
      %31 = arith.addf %28, %30 : vector<8x128xf32>
      %c0_27 = arith.constant 0 : index
      %c0_28 = arith.constant 0 : index
      %32 = vector.load %arg9[%c0_27, %c0_28] : memref<8x128xf32, #tpu.memory_space<vmem>>, vector<8x128xf32>
      tpu.vector_store %arg9[%c0_27, %c0_28], %31 {strides = array<i32>} : memref<8x128xf32, #tpu.memory_space<vmem>>, vector<8x128xf32>,
    } else {
    }
    return
  }
  func.func @transform_0(%arg0: i32, %arg1: i32) -> (i32, i32) {
    %c0_i32 = arith.constant 0 : i32
    %c0_i32_0 = arith.constant 0 : i32
    return %arg0, %c0_i32 : i32, i32
  }
  func.func @transform_1(%arg0: i32, %arg1: i32) -> (i32, i32) {
    %c0_i32 = arith.constant 0 : i32
    %c0_i32_0 = arith.constant 0 : i32
    %c0_i32_1 = arith.constant 0 : i32
    return %c0_i32, %c0_i32_0 : i32, i32
  }
  func.func @transform_2(%arg0: i32, %arg1: i32) -> (i32, i32) {
    %c0_i32 = arith.constant 0 : i32
    %c0_i32_0 = arith.constant 0 : i32
    %c0_i32_1 = arith.constant 0 : i32
    return %c0_i32, %c0_i32_0 : i32, i32
  }
  func.func @transform_3(%arg0: i32, %arg1: i32) -> (i32, i32, i32) {
    %c0_i32 = arith.constant 0 : i32
    %c0_i32_0 = arith.constant 0 : i32
    %c0_i32_1 = arith.constant 0 : i32
    %c0_i32_2 = arith.constant 0 : i32
    return %c0_i32, %c0_i32_0, %c0_i32_1 : i32, i32, i32
  }
  func.func @transform_4(%arg0: i32, %arg1: i32) -> (i32, i32, i32) {
    %c0_i32 = arith.constant 0 : i32
    %c0_i32_0 = arith.constant 0 : i32
    %c0_i32_1 = arith.constant 0 : i32
    %c0_i32_2 = arith.constant 0 : i32
    return %c0_i32, %c0_i32_0, %c0_i32_1 : i32, i32, i32
  }
  func.func @transform_5(%arg0: i32, %arg1: i32) -> (i32, i32) {
    %c0_i32 = arith.constant 0 : i32
    %c0_i32_0 = arith.constant 0 : i32
    %c0_i32_1 = arith.constant 0 : i32
    return %c0_i32, %c0_i32_0 : i32, i32
  }
  func.func @transform_6(%arg0: i32, %arg1: i32) -> (i32, i32) {
    %c0_i32 = arith.constant 0 : i32
    %c0_i32_0 = arith.constant 0 : i32
    %c0_i32_1 = arith.constant 0 : i32
    return %c0_i32, %c0_i32_0 : i32, i32
  }
  func.func @transform_7(%arg0: i32, %arg1: i32) -> (i32, i32) {
    %c0_i32 = arith.constant 0 : i32
    %c0_i32_0 = arith.constant 0 : i32
    return %arg0, %c0_i32 : i32, i32
  }
}

</mosaic_0001>

<bundles_post_ra>
// kernel: _phenn_impl.1
= control target key start
LH: loop header
LB: loop body
LE: loop exit
PB: predicated region body
PF: predicated region fallthrough
CT: control target
= control target key end

     0   :  { %v747_v0 = vmov 0.0|0.0   ;;  %vm748_vm0 = vmmov 0   ;;  %v749_v4 = vmov 0.0   ;;  %s1040_s1 = inlined_call_operand.vmem [shape: f32[128,128], index: 1, kind: input, shape index: {}]   ;;  %s1041_s3 = inlined_call_operand.vmem [shape: f32[2,128,128], index: 3, kind: input, shape index: {}]   ;;  %s1042_s0 = inlined_call_operand.vmem [shape: f32[8,128], index: 0, kind: input, shape index: {}]   ;;  %s1043_s2 = inlined_call_operand.vmem [shape: f32[1,128], index: 2, kind: input, shape index: {}]   ;;  %s1044_s5 = inlined_call_operand.vmem [shape: f32[128,128], index: 5, kind: input, shape index: {}]   ;;  %s1045_s4 = inlined_call_operand.vmem [shape: f32[2,1,128], index: 4, kind: input, shape index: {}]   ;;  %s1046_s6 = inlined_call_operand.vmem [shape: f32[1,128], index: 6, kind: input, shape index: {}]   ;;  %s1047_s7 = inlined_call_operand.vmem [shape: f32[8,128], index: 7, kind: output, shape index: {}]  }
   0x1   :  { %648 = vmatprep.subr.bf16.mxu0 %v747_v0  ;;  %v31_v1 = vld [vmem:[%s1040_s1] sm:$0xff]  ;;  %v32_v2 = vld [vmem:[%s1040_s1 + $0x8] sm:$0xff]  ;;  %v33_v3 = vld [vmem:[%s1040_s1 + $0x10] sm:$0xff]  ;;  %540 = vmatprep.mubr.msk.f32.mxu0 %vm748_vm0, %v749_v4 }
   0x2   :  { %v649_v5 = vpack.c.bf16 %v32_v2, %v31_v1  ;;  %v34_v6 = vld [vmem:[%s1040_s1 + $0x18] sm:$0xff]  ;;  %672 = vmatprep.subr.bf16.mxu1 %v747_v0  ;;  %575 = vmatprep.mubr.msk.f32.mxu1 %vm748_vm0, %v749_v4  ;;  %v35_v8 = vld [vmem:[%s1040_s1 + $0x20] sm:$0xff]  ;;  %v36_v9 = vld [vmem:[%s1040_s1 + $0x28] sm:$0xff] }
   0x3   :  { %v652_v7 = vpack.c.bf16 %v34_v6, %v33_v3  ;;  %v126_v10 = vld [vmem:[%s1041_s3] sm:$0xff]  ;;  %v127_v11 = vld [vmem:[%s1041_s3 + $0x8] sm:$0xff]  ;;  %v128_v12 = vld [vmem:[%s1041_s3 + $0x10] sm:$0xff]  ;;  %v655_v14 = vpack.c.bf16 %v36_v9, %v35_v8 }
   0x4   :  { %650 = vmatpush3.bf16.msra.mxu0 %v649_v5  ;;  %v129_v13 = vld [vmem:[%s1041_s3 + $0x18] sm:$0xff]  ;;  %v673_v15 = vpack.c.bf16 %v127_v11, %v126_v10  ;;  %v37_v16 = vld [vmem:[%s1040_s1 + $0x30] sm:$0xff]  ;;  %v130_v19 = vld [vmem:[%s1041_s3 + $0x20] sm:$0xff] }
   0x5   :  { %651 = vmatprep.subr.bf16.mxu0 %v747_v0  ;;  %v38_v17 = vld [vmem:[%s1040_s1 + $0x38] sm:$0xff]  ;;  %v676_v18 = vpack.c.bf16 %v129_v13, %v128_v12  ;;  %v131_v20 = vld [vmem:[%s1041_s3 + $0x28] sm:$0xff]  ;;  %v39_v22 = vld [vmem:[%s1040_s1 + $0x40] sm:$0xff] }
   0x6   :  { %674 = vmatpush3.bf16.msra.mxu1 %v673_v15  ;;  %v658_v21 = vpack.c.bf16 %v38_v17, %v37_v16  ;;  %v40_v23 = vld [vmem:[%s1040_s1 + $0x48] sm:$0xff]  ;;  %v679_v24 = vpack.c.bf16 %v131_v20, %v130_v19  ;;  %v132_v25 = vld [vmem:[%s1041_s3 + $0x30] sm:$0xff]  ;;  %v133_v26 = vld [vmem:[%s1041_s3 + $0x38] sm:$0xff] }
   0x7   :  { %675 = vmatprep.subr.bf16.mxu1 %v747_v0  ;;  %v661_v27 = vpack.c.bf16 %v40_v23, %v39_v22  ;;  %v41_v28 = vld [vmem:[%s1040_s1 + $0x50] sm:$0xff]  ;;  %v42_v29 = vld [vmem:[%s1040_s1 + $0x58] sm:$0xff]  ;;  %v682_v30 = vpack.c.bf16 %v133_v26, %v132_v25  ;;  %v134_v31 = vld [vmem:[%s1041_s3 + $0x40] sm:$0xff] }
   0x8   :  { %653 = vmatpush3.bf16.msra.mxu0 %v652_v7  ;;  %v135_v32 = vld [vmem:[%s1041_s3 + $0x48] sm:$0xff]  ;;  %v664_v33 = vpack.c.bf16 %v42_v29, %v41_v28  ;;  %v43_v34 = vld [vmem:[%s1040_s1 + $0x60] sm:$0xff]  ;;  %v136_v37 = vld [vmem:[%s1041_s3 + $0x50] sm:$0xff] }
   0x9   :  { %654 = vmatprep.subr.bf16.mxu0 %v747_v0  ;;  %v44_v35 = vld [vmem:[%s1040_s1 + $0x68] sm:$0xff]  ;;  %v685_v36 = vpack.c.bf16 %v135_v32, %v134_v31  ;;  %v137_v38 = vld [vmem:[%s1041_s3 + $0x58] sm:$0xff]  ;;  %v45_v40 = vld [vmem:[%s1040_s1 + $0x70] sm:$0xff] }
   0xa   :  { %677 = vmatpush3.bf16.msra.mxu1 %v676_v18  ;;  %v667_v39 = vpack.c.bf16 %v44_v35, %v43_v34  ;;  %v46_v41 = vld [vmem:[%s1040_s1 + $0x78] sm:$0xff]  ;;  %v688_v42 = vpack.c.bf16 %v137_v38, %v136_v37  ;;  %v138_v43 = vld [vmem:[%s1041_s3 + $0x60] sm:$0xff]  ;;  %v139_v44 = vld [vmem:[%s1041_s3 + $0x68] sm:$0xff] }
   0xb   :  { %678 = vmatprep.subr.bf16.mxu1 %v747_v0  ;;  %v670_v45 = vpack.c.bf16 %v46_v41, %v45_v40  ;;  %v691_v46 = vpack.c.bf16 %v139_v44, %v138_v43  ;;  %v30_v47 = vld [vmem:[%s1042_s0] sm:$0xff]  ;;  %v140_v48 = vld [vmem:[%s1041_s3 + $0x70] sm:$0xff]  ;;  %v141_v49 = vld [vmem:[%s1041_s3 + $0x78] sm:$0xff] }
   0xc   :  { %656 = vmatpush3.bf16.msra.mxu0 %v655_v14  ;;  %v694_v50 = vpack.c.bf16 %v141_v49, %v140_v48  ;;  %v421_v51 = vld [vmem:[%s1041_s3 + $0x80] sm:$0xff]  ;;  %v422_v52 = vld [vmem:[%s1041_s3 + $0x88] sm:$0xff]  ;;  %v423_v53 = vld [vmem:[%s1041_s3 + $0x90] sm:$0xff] }
   0xd   :  { %657 = vmatprep.subr.bf16.mxu0 %v747_v0  ;;  %v697_v54 = vpack.c.bf16 %v422_v52, %v421_v51  ;;  %v424_v55 = vld [vmem:[%s1041_s3 + $0x98] sm:$0xff]  ;;  %v425_v57 = vld [vmem:[%s1041_s3 + $0xa0] sm:$0xff]  ;;  %v426_v58 = vld [vmem:[%s1041_s3 + $0xa8] sm:$0xff] }
   0xe   :  { %680 = vmatpush3.bf16.msra.mxu1 %v679_v24  ;;  %v700_v56 = vpack.c.bf16 %v424_v55, %v423_v53  ;;  %v703_v59 = vpack.c.bf16 %v426_v58, %v425_v57  ;;  %v427_v60 = vld [vmem:[%s1041_s3 + $0xb0] sm:$0xff]  ;;  %v428_v61 = vld [vmem:[%s1041_s3 + $0xb8] sm:$0xff]  ;;  %v429_v63 = vld [vmem:[%s1041_s3 + $0xc0] sm:$0xff] }
   0xf   :  { %681 = vmatprep.subr.bf16.mxu1 %v747_v0  ;;  %v706_v62 = vpack.c.bf16 %v428_v61, %v427_v60  ;;  %v430_v1 = vld [vmem:[%s1041_s3 + $0xc8] sm:$0xff]  ;;  %v431_v3 = vld [vmem:[%s1041_s3 + $0xd0] sm:$0xff]  ;;  %v432_v5 = vld [vmem:[%s1041_s3 + $0xd8] sm:$0xff] }
  0x10   :  { %659 = vmatpush3.bf16.msra.mxu0 %v658_v21  ;;  %v709_v2 = vpack.c.bf16 %v430_v1, %v429_v63  ;;  %v712_v6 = vpack.c.bf16 %v432_v5, %v431_v3  ;;  %v433_v7 = vld [vmem:[%s1041_s3 + $0xe0] sm:$0xff]  ;;  %v434_v8 = vld [vmem:[%s1041_s3 + $0xe8] sm:$0xff]  ;;  %v435_v14 = vld [vmem:[%s1041_s3 + $0xf0] sm:$0xff] }
  0x11   :  { %660 = vmatprep.subr.bf16.mxu0 %v747_v0  ;;  %v715_v9 = vpack.c.bf16 %v434_v8, %v433_v7  ;;  %v419_v10 = vld [vmem:[%s1043_s2] ss:$0 sm:$0xff]  ;;  %v436_v15 = vld [vmem:[%s1041_s3 + $0xf8] sm:$0xff]  ;;  %v322_v18 = vld [vmem:[%s1044_s5 + $0x8] sm:$0xff] }
  0x12   :  { %683 = vmatpush3.bf16.msra.mxu1 %v682_v30  ;;  %v718_v16 = vpack.c.bf16 %v436_v15, %v435_v14  ;;  %v321_v17 = vld [vmem:[%s1044_s5] sm:$0xff]  ;;  %v324_v20 = vld [vmem:[%s1044_s5 + $0x18] sm:$0xff]  ;;  %v326_v23 = vld [vmem:[%s1044_s5 + $0x28] sm:$0xff] }
  0x13   :  { %684 = vmatprep.subr.bf16.mxu1 %v747_v0  ;;  %v721_v19 = vpack.c.bf16 %v322_v18, %v321_v17  ;;  %v325_v22 = vld [vmem:[%s1044_s5 + $0x20] sm:$0xff]  ;;  %v327_v25 = vld [vmem:[%s1044_s5 + $0x30] sm:$0xff]  ;;  %v328_v26 = vld [vmem:[%s1044_s5 + $0x38] sm:$0xff] }
  0x14   :  { %662 = vmatpush3.bf16.msra.mxu0 %v661_v27  ;;  %v727_v24 = vpack.c.bf16 %v326_v23, %v325_v22  ;;  %v730_v27 = vpack.c.bf16 %v328_v26, %v327_v25  ;;  %v329_v28 = vld [vmem:[%s1044_s5 + $0x40] sm:$0xff]  ;;  %v330_v29 = vld [vmem:[%s1044_s5 + $0x48] sm:$0xff]  ;;  %v331_v31 = vld [vmem:[%s1044_s5 + $0x50] sm:$0xff] }
  0x15   :  { %663 = vmatprep.subr.bf16.mxu0 %v747_v0  ;;  %v733_v30 = vpack.c.bf16 %v330_v29, %v329_v28  ;;  %v332_v32 = vld [vmem:[%s1044_s5 + $0x58] sm:$0xff]  ;;  %v333_v34 = vld [vmem:[%s1044_s5 + $0x60] sm:$0xff]  ;;  %v334_v35 = vld [vmem:[%s1044_s5 + $0x68] sm:$0xff] }
  0x16   :  { %686 = vmatpush3.bf16.msra.mxu1 %v685_v36  ;;  %v739_v36 = vpack.c.bf16 %v334_v35, %v333_v34  ;;  %v420_v37 = vld [vmem:[%s1045_s4] ss:$0 sm:$0xff]  ;;  %v336_v43 = vld [vmem:[%s1044_s5 + $0x78] sm:$0xff] }
  0x17   :  { %687 = vmatprep.subr.bf16.mxu1 %v747_v0  ;;  %v439_v49 = vld [vmem:[%s1046_s6] ss:$0 sm:$0xff] }
  0x18   :  { %665 = vmatpush3.bf16.msra.mxu0 %v664_v33  ;;  %v736_v33 = vpack.c.bf16 %v332_v32, %v331_v31 }
  0x19   :  { %666 = vmatprep.subr.bf16.mxu0 %v747_v0 }
  0x1a   :  { %689 = vmatpush3.bf16.msra.mxu1 %v688_v42  ;;  %v335_v42 = vld [vmem:[%s1044_s5 + $0x70] sm:$0xff] }
  0x1b   :  { %690 = vmatprep.subr.bf16.mxu1 %v747_v0  ;;  %v742_v44 = vpack.c.bf16 %v336_v43, %v335_v42 }
  0x1c   :  { %668 = vmatpush3.bf16.msra.mxu0 %v667_v39 }
  0x1d   :  { %669 = vmatprep.subr.bf16.mxu0 %v747_v0 }
  0x1e   :  { %692 = vmatpush3.bf16.msra.mxu1 %v691_v46 }
  0x1f   :  { %693 = vmatprep.subr.bf16.mxu1 %v747_v0 }
  0x20   :  { %671 = vmatpush3.bf16.msra.mxu0 %v670_v45 }
  0x21   :  { %696 = vmatprep.subr.bf16.mxu0 %v747_v0 }
  0x22   :  { %695 = vmatpush3.bf16.msra.mxu1 %v694_v50 }
  0x23   :  { %541 = vmatmul.mubr.f32.vlgmr.msra.gmra.mrb[0].mxu0 %v30_v47  ;;  %720 = vmatprep.subr.bf16.mxu1 %v747_v0 }
  0x24   :  { %610 = vmatprep.mubr.msk.f32.mxu0 %vm748_vm0, %v749_v4  ;;  %698 = vmatpush3.bf16.msra.mxu0 %v697_v54 }
  0x25   :  { %699 = vmatprep.subr.bf16.mxu0 %v747_v0 }
  0x28   :  { %701 = vmatpush3.bf16.msra.mxu0 %v700_v56 }
  0x29   :  { %702 = vmatprep.subr.bf16.mxu0 %v747_v0 }
  0x2c   :  { %704 = vmatpush3.bf16.msra.mxu0 %v703_v59 }
  0x2d   :  { %705 = vmatprep.subr.bf16.mxu0 %v747_v0 }
  0x30   :  { %707 = vmatpush3.bf16.msra.mxu0 %v706_v62 }
  0x31   :  { %708 = vmatprep.subr.bf16.mxu0 %v747_v0 }
  0x34   :  { %710 = vmatpush3.bf16.msra.mxu0 %v709_v2 }
  0x35   :  { %711 = vmatprep.subr.bf16.mxu0 %v747_v0 }
  0x38   :  { %713 = vmatpush3.bf16.msra.mxu0 %v712_v6 }
  0x39   :  { %714 = vmatprep.subr.bf16.mxu0 %v747_v0 }
  0x3c   :  { %716 = vmatpush3.bf16.msra.mxu0 %v715_v9 }
  0x3d   :  { %717 = vmatprep.subr.bf16.mxu0 %v747_v0 }
  0x40   :  { %719 = vmatpush3.bf16.msra.mxu0 %v718_v16 }
  0xf6   :  { %v120_v11 = vpop.f32.mrb[0].mxu0 }
  0xf7   :  { %v121_v12 = vadd.f32 %v419_v10, %v120_v11  ;;  %v542_v13 = vpop.f32.mrb[1].mxu0 }
  0xf9   :  { %576 = vmatmul.mubr.f32.vlgmr.msra.gmra.mrb[0].mxu1 %v121_v12 }
  0xfa   :  { %645 = vmatprep.mubr.msk.f32.mxu1 %vm748_vm0, %v749_v4  ;;  %v323_v4 = vld [vmem:[%s1044_s5 + $0x10] sm:$0xff]  ;;  %722 = vmatpush3.bf16.msra.mxu1 %v721_v19 }
  0xfb   :  { %v724_v21 = vpack.c.bf16 %v324_v20, %v323_v4  ;;  %723 = vmatprep.subr.bf16.mxu1 %v747_v0 }
  0xfe   :  { %725 = vmatpush3.bf16.msra.mxu1 %v724_v21 }
  0xff   :  { %726 = vmatprep.subr.bf16.mxu1 %v747_v0 }
 0x102   :  { %728 = vmatpush3.bf16.msra.mxu1 %v727_v24 }
 0x103   :  { %729 = vmatprep.subr.bf16.mxu1 %v747_v0 }
 0x106   :  { %731 = vmatpush3.bf16.msra.mxu1 %v730_v27 }
 0x107   :  { %732 = vmatprep.subr.bf16.mxu1 %v747_v0 }
 0x10a   :  { %734 = vmatpush3.bf16.msra.mxu1 %v733_v30 }
 0x10b   :  { %735 = vmatprep.subr.bf16.mxu1 %v747_v0 }
 0x10e   :  { %737 = vmatpush3.bf16.msra.mxu1 %v736_v33 }
 0x10f   :  { %738 = vmatprep.subr.bf16.mxu1 %v747_v0 }
 0x112   :  { %740 = vmatpush3.bf16.msra.mxu1 %v739_v36 }
 0x113   :  { %741 = vmatprep.subr.bf16.mxu1 %v747_v0  ;;  %v438_v0 = vld [vmem:[%s1045_s4 + $0x1] ss:$0 sm:$0xff] }
 0x116   :  { %743 = vmatpush3.bf16.msra.mxu1 %v742_v44 }
 0x1cc   :  { %v215_v38 = vpop.f32.mrb[0].mxu1 }
 0x1cd   :  { %v216_v39 = vadd.f32 %v420_v37, %v215_v38  ;;  %v577_v40 = vpop.f32.mrb[1].mxu1 }
 0x1cf   :  { %v219_v41 = vmax.f32 %v216_v39, 0.0 }
 0x1d1   :  { %611 = vmatmul.mubr.f32.vlgmr.msra.gmra.mrb[2].mxu0 %v219_v41 }
 0x2a4   :  { %v311_v45 = vpop.f32.mrb[2].mxu0 }
 0x2a5   :  { %v312_v46 = vadd.f32 %v438_v0, %v311_v45  ;;  %v612_v47 = vpop.f32.mrb[3].mxu0 }
 0x2a7   :  { %v315_v48 = vmax.f32 %v312_v46, 0.0 }
 0x2a9   :  { %646 = vmatmul.mubr.f32.vlgmr.msra.gmra.mrb[2].mxu1 %v315_v48 }
 0x37c   :  { %v410_v50 = vpop.f32.mrb[2].mxu1 }
 0x37d   :  { %v411_v51 = vadd.f32 %v439_v49, %v410_v50  ;;  %v647_v52 = vpop.f32.mrb[3].mxu1 }
 0x37f   :  { %414 = vst [vmem:[%s1047_s7] sm:$0xff] %v411_v51 }

// kernel: _phenn_impl.1
= control target key start
LH: loop header
LB: loop body
LE: loop exit
PB: predicated region body
PF: predicated region fallthrough
CT: control target
= control target key end

     0   :  { %v747_v0 = vmov 0.0|0.0   ;;  %vm748_vm0 = vmmov 0   ;;  %v749_v4 = vmov 0.0   ;;  %s1040_s1 = inlined_call_operand.vmem [shape: f32[128,128], index: 1, kind: input, shape index: {}]   ;;  %s1041_s3 = inlined_call_operand.vmem [shape: f32[2,128,128], index: 3, kind: input, shape index: {}]   ;;  %s1042_s0 = inlined_call_operand.vmem [shape: f32[8,128], index: 0, kind: input, shape index: {}]   ;;  %s1043_s2 = inlined_call_operand.vmem [shape: f32[1,128], index: 2, kind: input, shape index: {}]   ;;  %s1044_s5 = inlined_call_operand.vmem [shape: f32[128,128], index: 5, kind: input, shape index: {}]   ;;  %s1045_s4 = inlined_call_operand.vmem [shape: f32[2,1,128], index: 4, kind: input, shape index: {}]   ;;  %s1046_s6 = inlined_call_operand.vmem [shape: f32[1,128], index: 6, kind: input, shape index: {}]   ;;  %s1047_s7 = inlined_call_operand.vmem [shape: f32[8,128], index: 7, kind: output, shape index: {}]  }
   0x1   :  { %648 = vmatprep.subr.bf16.mxu0 %v747_v0  ;;  %v31_v1 = vld [vmem:[%s1040_s1] sm:$0xff]  ;;  %v32_v2 = vld [vmem:[%s1040_s1 + $0x8] sm:$0xff]  ;;  %v33_v3 = vld [vmem:[%s1040_s1 + $0x10] sm:$0xff]  ;;  %540 = vmatprep.mubr.msk.f32.mxu0 %vm748_vm0, %v749_v4 }
   0x2   :  { %v649_v5 = vpack.c.bf16 %v32_v2, %v31_v1  ;;  %v34_v6 = vld [vmem:[%s1040_s1 + $0x18] sm:$0xff]  ;;  %672 = vmatprep.subr.bf16.mxu1 %v747_v0  ;;  %575 = vmatprep.mubr.msk.f32.mxu1 %vm748_vm0, %v749_v4  ;;  %v35_v8 = vld [vmem:[%s1040_s1 + $0x20] sm:$0xff]  ;;  %v36_v9 = vld [vmem:[%s1040_s1 + $0x28] sm:$0xff] }
   0x3   :  { %v652_v7 = vpack.c.bf16 %v34_v6, %v33_v3  ;;  %v126_v10 = vld [vmem:[%s1041_s3] sm:$0xff]  ;;  %v127_v11 = vld [vmem:[%s1041_s3 + $0x8] sm:$0xff]  ;;  %v128_v12 = vld [vmem:[%s1041_s3 + $0x10] sm:$0xff]  ;;  %v655_v14 = vpack.c.bf16 %v36_v9, %v35_v8 }
   0x4   :  { %650 = vmatpush3.bf16.msra.mxu0 %v649_v5  ;;  %v129_v13 = vld [vmem:[%s1041_s3 + $0x18] sm:$0xff]  ;;  %v673_v15 = vpack.c.bf16 %v127_v11, %v126_v10  ;;  %v37_v16 = vld [vmem:[%s1040_s1 + $0x30] sm:$0xff]  ;;  %v130_v19 = vld [vmem:[%s1041_s3 + $0x20] sm:$0xff] }
   0x5   :  { %651 = vmatprep.subr.bf16.mxu0 %v747_v0  ;;  %v38_v17 = vld [vmem:[%s1040_s1 + $0x38] sm:$0xff]  ;;  %v676_v18 = vpack.c.bf16 %v129_v13, %v128_v12  ;;  %v131_v20 = vld [vmem:[%s1041_s3 + $0x28] sm:$0xff]  ;;  %v39_v22 = vld [vmem:[%s1040_s1 + $0x40] sm:$0xff] }
   0x6   :  { %674 = vmatpush3.bf16.msra.mxu1 %v673_v15  ;;  %v658_v21 = vpack.c.bf16 %v38_v17, %v37_v16  ;;  %v40_v23 = vld [vmem:[%s1040_s1 + $0x48] sm:$0xff]  ;;  %v679_v24 = vpack.c.bf16 %v131_v20, %v130_v19  ;;  %v132_v25 = vld [vmem:[%s1041_s3 + $0x30] sm:$0xff]  ;;  %v133_v26 = vld [vmem:[%s1041_s3 + $0x38] sm:$0xff] }
   0x7   :  { %675 = vmatprep.subr.bf16.mxu1 %v747_v0  ;;  %v661_v27 = vpack.c.bf16 %v40_v23, %v39_v22  ;;  %v41_v28 = vld [vmem:[%s1040_s1 + $0x50] sm:$0xff]  ;;  %v42_v29 = vld [vmem:[%s1040_s1 + $0x58] sm:$0xff]  ;;  %v682_v30 = vpack.c.bf16 %v133_v26, %v132_v25  ;;  %v134_v31 = vld [vmem:[%s1041_s3 + $0x40] sm:$0xff] }
   0x8   :  { %653 = vmatpush3.bf16.msra.mxu0 %v652_v7  ;;  %v135_v32 = vld [vmem:[%s1041_s3 + $0x48] sm:$0xff]  ;;  %v664_v33 = vpack.c.bf16 %v42_v29, %v41_v28  ;;  %v43_v34 = vld [vmem:[%s1040_s1 + $0x60] sm:$0xff]  ;;  %v136_v37 = vld [vmem:[%s1041_s3 + $0x50] sm:$0xff] }
   0x9   :  { %654 = vmatprep.subr.bf16.mxu0 %v747_v0  ;;  %v44_v35 = vld [vmem:[%s1040_s1 + $0x68] sm:$0xff]  ;;  %v685_v36 = vpack.c.bf16 %v135_v32, %v134_v31  ;;  %v137_v38 = vld [vmem:[%s1041_s3 + $0x58] sm:$0xff]  ;;  %v45_v40 = vld [vmem:[%s1040_s1 + $0x70] sm:$0xff] }
   0xa   :  { %677 = vmatpush3.bf16.msra.mxu1 %v676_v18  ;;  %v667_v39 = vpack.c.bf16 %v44_v35, %v43_v34  ;;  %v46_v41 = vld [vmem:[%s1040_s1 + $0x78] sm:$0xff]  ;;  %v688_v42 = vpack.c.bf16 %v137_v38, %v136_v37  ;;  %v138_v43 = vld [vmem:[%s1041_s3 + $0x60] sm:$0xff]  ;;  %v139_v44 = vld [vmem:[%s1041_s3 + $0x68] sm:$0xff] }
   0xb   :  { %678 = vmatprep.subr.bf16.mxu1 %v747_v0  ;;  %v670_v45 = vpack.c.bf16 %v46_v41, %v45_v40  ;;  %v691_v46 = vpack.c.bf16 %v139_v44, %v138_v43  ;;  %v30_v47 = vld [vmem:[%s1042_s0] sm:$0xff]  ;;  %v140_v48 = vld [vmem:[%s1041_s3 + $0x70] sm:$0xff]  ;;  %v141_v49 = vld [vmem:[%s1041_s3 + $0x78] sm:$0xff] }
   0xc   :  { %656 = vmatpush3.bf16.msra.mxu0 %v655_v14  ;;  %v694_v50 = vpack.c.bf16 %v141_v49, %v140_v48  ;;  %v421_v51 = vld [vmem:[%s1041_s3 + $0x80] sm:$0xff]  ;;  %v422_v52 = vld [vmem:[%s1041_s3 + $0x88] sm:$0xff]  ;;  %v423_v53 = vld [vmem:[%s1041_s3 + $0x90] sm:$0xff] }
   0xd   :  { %657 = vmatprep.subr.bf16.mxu0 %v747_v0  ;;  %v697_v54 = vpack.c.bf16 %v422_v52, %v421_v51  ;;  %v424_v55 = vld [vmem:[%s1041_s3 + $0x98] sm:$0xff]  ;;  %v425_v57 = vld [vmem:[%s1041_s3 + $0xa0] sm:$0xff]  ;;  %v426_v58 = vld [vmem:[%s1041_s3 + $0xa8] sm:$0xff] }
   0xe   :  { %680 = vmatpush3.bf16.msra.mxu1 %v679_v24  ;;  %v700_v56 = vpack.c.bf16 %v424_v55, %v423_v53  ;;  %v703_v59 = vpack.c.bf16 %v426_v58, %v425_v57  ;;  %v427_v60 = vld [vmem:[%s1041_s3 + $0xb0] sm:$0xff]  ;;  %v428_v61 = vld [vmem:[%s1041_s3 + $0xb8] sm:$0xff]  ;;  %v429_v63 = vld [vmem:[%s1041_s3 + $0xc0] sm:$0xff] }
   0xf   :  { %681 = vmatprep.subr.bf16.mxu1 %v747_v0  ;;  %v706_v62 = vpack.c.bf16 %v428_v61, %v427_v60  ;;  %v430_v1 = vld [vmem:[%s1041_s3 + $0xc8] sm:$0xff]  ;;  %v431_v3 = vld [vmem:[%s1041_s3 + $0xd0] sm:$0xff]  ;;  %v432_v5 = vld [vmem:[%s1041_s3 + $0xd8] sm:$0xff] }
  0x10   :  { %659 = vmatpush3.bf16.msra.mxu0 %v658_v21  ;;  %v709_v2 = vpack.c.bf16 %v430_v1, %v429_v63  ;;  %v712_v6 = vpack.c.bf16 %v432_v5, %v431_v3  ;;  %v433_v7 = vld [vmem:[%s1041_s3 + $0xe0] sm:$0xff]  ;;  %v434_v8 = vld [vmem:[%s1041_s3 + $0xe8] sm:$0xff]  ;;  %v435_v14 = vld [vmem:[%s1041_s3 + $0xf0] sm:$0xff] }
  0x11   :  { %660 = vmatprep.subr.bf16.mxu0 %v747_v0  ;;  %v715_v9 = vpack.c.bf16 %v434_v8, %v433_v7  ;;  %v419_v10 = vld [vmem:[%s1043_s2] ss:$0 sm:$0xff]  ;;  %v436_v15 = vld [vmem:[%s1041_s3 + $0xf8] sm:$0xff]  ;;  %v322_v18 = vld [vmem:[%s1044_s5 + $0x8] sm:$0xff] }
  0x12   :  { %683 = vmatpush3.bf16.msra.mxu1 %v682_v30  ;;  %v718_v16 = vpack.c.bf16 %v436_v15, %v435_v14  ;;  %v321_v17 = vld [vmem:[%s1044_s5] sm:$0xff]  ;;  %v324_v20 = vld [vmem:[%s1044_s5 + $0x18] sm:$0xff]  ;;  %v326_v23 = vld [vmem:[%s1044_s5 + $0x28] sm:$0xff] }
  0x13   :  { %684 = vmatprep.subr.bf16.mxu1 %v747_v0  ;;  %v721_v19 = vpack.c.bf16 %v322_v18, %v321_v17  ;;  %v325_v22 = vld [vmem:[%s1044_s5 + $0x20] sm:$0xff]  ;;  %v327_v25 = vld [vmem:[%s1044_s5 + $0x30] sm:$0xff]  ;;  %v328_v26 = vld [vmem:[%s1044_s5 + $0x38] sm:$0xff] }
  0x14   :  { %662 = vmatpush3.bf16.msra.mxu0 %v661_v27  ;;  %v727_v24 = vpack.c.bf16 %v326_v23, %v325_v22  ;;  %v730_v27 = vpack.c.bf16 %v328_v26, %v327_v25  ;;  %v329_v28 = vld [vmem:[%s1044_s5 + $0x40] sm:$0xff]  ;;  %v330_v29 = vld [vmem:[%s1044_s5 + $0x48] sm:$0xff]  ;;  %v331_v31 = vld [vmem:[%s1044_s5 + $0x50] sm:$0xff] }
  0x15   :  { %663 = vmatprep.subr.bf16.mxu0 %v747_v0  ;;  %v733_v30 = vpack.c.bf16 %v330_v29, %v329_v28  ;;  %v332_v32 = vld [vmem:[%s1044_s5 + $0x58] sm:$0xff]  ;;  %v333_v34 = vld [vmem:[%s1044_s5 + $0x60] sm:$0xff]  ;;  %v334_v35 = vld [vmem:[%s1044_s5 + $0x68] sm:$0xff] }
  0x16   :  { %686 = vmatpush3.bf16.msra.mxu1 %v685_v36  ;;  %v739_v36 = vpack.c.bf16 %v334_v35, %v333_v34  ;;  %v420_v37 = vld [vmem:[%s1045_s4] ss:$0 sm:$0xff]  ;;  %v336_v43 = vld [vmem:[%s1044_s5 + $0x78] sm:$0xff] }
  0x17   :  { %687 = vmatprep.subr.bf16.mxu1 %v747_v0  ;;  %v439_v49 = vld [vmem:[%s1046_s6] ss:$0 sm:$0xff] }
  0x18   :  { %665 = vmatpush3.bf16.msra.mxu0 %v664_v33  ;;  %v736_v33 = vpack.c.bf16 %v332_v32, %v331_v31 }
  0x19   :  { %666 = vmatprep.subr.bf16.mxu0 %v747_v0 }
  0x1a   :  { %689 = vmatpush3.bf16.msra.mxu1 %v688_v42  ;;  %v335_v42 = vld [vmem:[%s1044_s5 + $0x70] sm:$0xff] }
  0x1b   :  { %690 = vmatprep.subr.bf16.mxu1 %v747_v0  ;;  %v742_v44 = vpack.c.bf16 %v336_v43, %v335_v42 }
  0x1c   :  { %668 = vmatpush3.bf16.msra.mxu0 %v667_v39 }
  0x1d   :  { %669 = vmatprep.subr.bf16.mxu0 %v747_v0 }
  0x1e   :  { %692 = vmatpush3.bf16.msra.mxu1 %v691_v46 }
  0x1f   :  { %693 = vmatprep.subr.bf16.mxu1 %v747_v0 }
  0x20   :  { %671 = vmatpush3.bf16.msra.mxu0 %v670_v45 }
  0x21   :  { %696 = vmatprep.subr.bf16.mxu0 %v747_v0 }
  0x22   :  { %695 = vmatpush3.bf16.msra.mxu1 %v694_v50 }
  0x23   :  { %541 = vmatmul.mubr.f32.vlgmr.msra.gmra.mrb[0].mxu0 %v30_v47  ;;  %720 = vmatprep.subr.bf16.mxu1 %v747_v0 }
  0x24   :  { %610 = vmatprep.mubr.msk.f32.mxu0 %vm748_vm0, %v749_v4  ;;  %698 = vmatpush3.bf16.msra.mxu0 %v697_v54 }
  0x25   :  { %699 = vmatprep.subr.bf16.mxu0 %v747_v0 }
  0x28   :  { %701 = vmatpush3.bf16.msra.mxu0 %v700_v56 }
  0x29   :  { %702 = vmatprep.subr.bf16.mxu0 %v747_v0 }
  0x2c   :  { %704 = vmatpush3.bf16.msra.mxu0 %v703_v59 }
  0x2d   :  { %705 = vmatprep.subr.bf16.mxu0 %v747_v0 }
  0x30   :  { %707 = vmatpush3.bf16.msra.mxu0 %v706_v62 }
  0x31   :  { %708 = vmatprep.subr.bf16.mxu0 %v747_v0 }
  0x34   :  { %710 = vmatpush3.bf16.msra.mxu0 %v709_v2 }
  0x35   :  { %711 = vmatprep.subr.bf16.mxu0 %v747_v0 }
  0x38   :  { %713 = vmatpush3.bf16.msra.mxu0 %v712_v6 }
  0x39   :  { %714 = vmatprep.subr.bf16.mxu0 %v747_v0 }
  0x3c   :  { %716 = vmatpush3.bf16.msra.mxu0 %v715_v9 }
  0x3d   :  { %717 = vmatprep.subr.bf16.mxu0 %v747_v0 }
  0x40   :  { %719 = vmatpush3.bf16.msra.mxu0 %v718_v16 }
  0xf6   :  { %v120_v11 = vpop.f32.mrb[0].mxu0 }
  0xf7   :  { %v121_v12 = vadd.f32 %v419_v10, %v120_v11  ;;  %v542_v13 = vpop.f32.mrb[1].mxu0 }
  0xf9   :  { %576 = vmatmul.mubr.f32.vlgmr.msra.gmra.mrb[0].mxu1 %v121_v12 }
  0xfa   :  { %645 = vmatprep.mubr.msk.f32.mxu1 %vm748_vm0, %v749_v4  ;;  %v323_v4 = vld [vmem:[%s1044_s5 + $0x10] sm:$0xff]  ;;  %722 = vmatpush3.bf16.msra.mxu1 %v721_v19 }
  0xfb   :  { %v724_v21 = vpack.c.bf16 %v324_v20, %v323_v4  ;;  %723 = vmatprep.subr.bf16.mxu1 %v747_v0 }
  0xfe   :  { %725 = vmatpush3.bf16.msra.mxu1 %v724_v21 }
  0xff   :  { %726 = vmatprep.subr.bf16.mxu1 %v747_v0 }
 0x102   :  { %728 = vmatpush3.bf16.msra.mxu1 %v727_v24 }
 0x103   :  { %729 = vmatprep.subr.bf16.mxu1 %v747_v0 }
 0x106   :  { %731 = vmatpush3.bf16.msra.mxu1 %v730_v27 }
 0x107   :  { %732 = vmatprep.subr.bf16.mxu1 %v747_v0 }
 0x10a   :  { %734 = vmatpush3.bf16.msra.mxu1 %v733_v30 }
 0x10b   :  { %735 = vmatprep.subr.bf16.mxu1 %v747_v0 }
 0x10e   :  { %737 = vmatpush3.bf16.msra.mxu1 %v736_v33 }
 0x10f   :  { %738 = vmatprep.subr.bf16.mxu1 %v747_v0 }
 0x112   :  { %740 = vmatpush3.bf16.msra.mxu1 %v739_v36 }
 0x113   :  { %741 = vmatprep.subr.bf16.mxu1 %v747_v0  ;;  %v438_v0 = vld [vmem:[%s1045_s4 + $0x1] ss:$0 sm:$0xff] }
 0x116   :  { %743 = vmatpush3.bf16.msra.mxu1 %v742_v44 }
 0x1cc   :  { %v215_v38 = vpop.f32.mrb[0].mxu1 }
 0x1cd   :  { %v216_v39 = vadd.f32 %v420_v37, %v215_v38  ;;  %v577_v40 = vpop.f32.mrb[1].mxu1 }
 0x1cf   :  { %v219_v41 = vmax.f32 %v216_v39, 0.0 }
 0x1d1   :  { %611 = vmatmul.mubr.f32.vlgmr.msra.gmra.mrb[2].mxu0 %v219_v41 }
 0x2a4   :  { %v311_v45 = vpop.f32.mrb[2].mxu0 }
 0x2a5   :  { %v312_v46 = vadd.f32 %v438_v0, %v311_v45  ;;  %v612_v47 = vpop.f32.mrb[3].mxu0 }
 0x2a7   :  { %v315_v48 = vmax.f32 %v312_v46, 0.0 }
 0x2a9   :  { %646 = vmatmul.mubr.f32.vlgmr.msra.gmra.mrb[2].mxu1 %v315_v48 }
 0x37c   :  { %v410_v50 = vpop.f32.mrb[2].mxu1 }
 0x37d   :  { %v411_v51 = vadd.f32 %v439_v49, %v410_v50  ;;  %v647_v52 = vpop.f32.mrb[3].mxu1 }
 0x37f   :  { %414 = vst [vmem:[%s1047_s7] sm:$0xff] %v411_v51 }

</bundles_post_ra>
